<compile_context>
chip_gen: v7x
topology: tpu7x:2x2x1
jax: 0.10.0
libtpu: 0.0.40
codegen_flags: <defaults>
</compile_context>

<pallas_src>
import functools

import jax
import jax.numpy as jnp
from jax.experimental import pallas as pl
from jax.experimental.pallas import tpu as pltpu


def _mul_conv1x1_kernel(w_ref, s_ref, x_ref, o_ref, *, k_slices):
    # w_ref: (Cout, Cin), s_ref: (1, Cin), x_ref: (Cin, M), o_ref: (Cout, M)
    acc = None
    for start, size in k_slices:  # static, small unrolled loop (2-3 chunks)
        # Scale-mul in f32 (exact, and avoids bf16-VPU issues on v5e), then cast the
        # scaled weight chunk back to the MXU input dtype (no-op for f32 inputs).
        w_k = w_ref[:, start:start + size].astype(jnp.float32)
        s_k = s_ref[:, start:start + size].astype(jnp.float32)   # sublane-broadcast
        ws_k = (w_k * s_k).astype(x_ref.dtype)
        x_k = x_ref[start:start + size, :]
        part = jnp.dot(ws_k, x_k, preferred_element_type=jnp.float32)
        acc = part if acc is None else acc + part
    o_ref[...] = acc.astype(o_ref.dtype)


def mul_conv2d_1x1(x_nchw, scale_nc11, weight_oihw, *, k_chunk=256):
    """Conv2d(1x1, no bias)(scale * x), matching the PyTorch module semantics.

    Channels-first formulation: no NCHW<->NHWC transposes; all wrapper reshapes are
    views of contiguous memory. Works for f32 or bf16 inputs (accumulation in f32).
    """
    n, cin, h, w = x_nchw.shape
    cout = weight_oihw.shape[0]
    assert weight_oihw.shape == (cout, cin, 1, 1)
    assert scale_nc11.shape == (1, cin, 1, 1)

    hw = h * w
    x_mat = x_nchw.reshape(n, cin, hw)        # (N, Cin, M)   — free reshape
    s_mat = scale_nc11.reshape(1, cin)        # (1, Cin)
    w_mat = weight_oihw.reshape(cout, cin)    # OIHW 1x1 -> (Cout, Cin) — free reshape

    # Static K chunks with lane-tile (128)-aligned starts so the weight's lane slices
    # stay tile-aligned; the tail chunk simply runs to the array edge.
    if cin <= k_chunk:
        k_slices = ((0, cin),)
    else:
        k_slices = tuple((s, min(k_chunk, cin - s)) for s in range(0, cin, k_chunk))

    dtype_bytes = jnp.dtype(x_mat.dtype).itemsize
    cost = pl.CostEstimate(
        flops=2 * n * hw * cin * cout,
        bytes_accessed=(n * cin * hw + cout * cin + cin + n * cout * hw) * dtype_bytes,
        transcendentals=0,
    )

    kernel = functools.partial(_mul_conv1x1_kernel, k_slices=k_slices)

    out_mat = pl.pallas_call(
        kernel,
        out_shape=jax.ShapeDtypeStruct((n, cout, hw), x_mat.dtype),
        # Grid only iterates batch (n == 1 for this module); everything fits in VMEM
        # in a single block on all generations, so no further tiling.
        grid=(n,),
        in_specs=[
            pl.BlockSpec((cout, cin), lambda b: (0, 0)),
            pl.BlockSpec((1, cin), lambda b: (0, 0)),
            pl.BlockSpec((None, cin, hw), lambda b: (b, 0, 0)),   # batch dim squeezed
        ],
        out_specs=pl.BlockSpec((None, cout, hw), lambda b: (b, 0, 0)),
        compiler_params=pltpu.CompilerParams(
            dimension_semantics=("arbitrary",)
        ),
        cost_estimate=cost,
    )(w_mat, s_mat, x_mat)

    # (N, Cout, M) -> (N, Cout, H, W): already channels-first, free reshape.
    return out_mat.reshape(n, cout, h, w)


if __name__ == "__main__":
    key = jax.random.PRNGKey(0)
    k1, k2, k3 = jax.random.split(key, 3)

    # Shapes from the module: 1x1 conv 672 -> 112 over 14x14 spatial, batch 1.
    x219 = jax.random.normal(k1, (1, 672, 14, 14), dtype=jnp.float32)
    x224 = jax.random.normal(k2, (1, 672, 1, 1), dtype=jnp.float32)
    conv_w = jax.random.normal(k3, (112, 672, 1, 1), dtype=jnp.float32) * 0.02

    # f32 path (matches the PyTorch module exactly).
    out = mul_conv2d_1x1(x219, x224, conv_w)
    jax.block_until_ready(out)
    ref = jnp.einsum("nchw,oc->nohw", x219 * x224, conv_w.reshape(112, 672))
    assert out.shape == (1, 112, 14, 14)
    assert jnp.allclose(out, ref, atol=1e-3, rtol=1e-3)

    # bf16 path (halves HBM traffic for the memory-bound op; scale-mul and matmul
    # accumulation stay in f32 inside the kernel).
    x_bf = x219.astype(jnp.bfloat16)
    s_bf = x224.astype(jnp.bfloat16)
    w_bf = conv_w.astype(jnp.bfloat16)
    out_bf = mul_conv2d_1x1(x_bf, s_bf, w_bf)
    jax.block_until_ready(out_bf)
    ref_bf = jnp.einsum(
        "nchw,oc->nohw",
        x_bf.astype(jnp.float32) * s_bf.astype(jnp.float32),
        w_bf.reshape(112, 672).astype(jnp.float32),
    )
    assert jnp.allclose(out_bf.astype(jnp.float32), ref_bf, atol=3e-2, rtol=3e-2)

    print("KERNEL_OK")
</pallas_src>

<mosaic_0001>
module attributes {stable_mosaic.version = 11 : i64} {
  func.func @_mul_conv1x1_kernel(%arg0: i32, %arg1: memref<112x672xf32, #tpu.memory_space<vmem>>, %arg2: memref<1x672xf32, #tpu.memory_space<vmem>>, %arg3: memref<1x672x196xf32, #tpu.memory_space<vmem>>, %arg4: memref<1x112x196xf32, #tpu.memory_space<vmem>>) attributes {dimension_semantics = [#tpu.dimension_semantics<arbitrary>], iteration_bounds = array<i64: 1>, scalar_prefetch = 0 : i64, scratch_operands = 0 : i64, tpu.core_type = #tpu.core_type<tc>, window_params = [{pipeline_mode = #tpu.pipeline_mode<synchronous>, transform_indices = @transform_0, window_bounds = array<i64: 112, 672>}, {pipeline_mode = #tpu.pipeline_mode<synchronous>, transform_indices = @transform_1, window_bounds = array<i64: 1, 672>}, {transform_indices = @transform_2, window_bounds = array<i64: 1, 672, 196>}, {transform_indices = @transform_3, window_bounds = array<i64: 1, 112, 196>}]} {
    %c0 = arith.constant 0 : index
    %c0_0 = arith.constant 0 : index
    %0 = vector.load %arg1[%c0, %c0_0] : memref<112x672xf32, #tpu.memory_space<vmem>>, vector<112x256xf32>
    %c0_1 = arith.constant 0 : index
    %c0_2 = arith.constant 0 : index
    %1 = vector.load %arg2[%c0_1, %c0_2] : memref<1x672xf32, #tpu.memory_space<vmem>>, vector<1x256xf32>
    %2 = vector.broadcast %1 : vector<1x256xf32> to vector<112x256xf32>
    %3 = arith.mulf %0, %2 : vector<112x256xf32>
    %c0_3 = arith.constant 0 : index
    %c0_4 = arith.constant 0 : index
    %c0_5 = arith.constant 0 : index
    %4 = vector.load %arg3[%c0_3, %c0_4, %c0_5] : memref<1x672x196xf32, #tpu.memory_space<vmem>>, vector<1x256x196xf32>
    %5 = vector.shape_cast %4 : vector<1x256x196xf32> to vector<256x196xf32>
    %cst = arith.constant dense<0.000000e+00> : vector<112x196xf32>
    %6 = tpu.matmul %3, %5, %cst {dimension_numbers = #tpu.dot_dimension_numbers<[1], [0], [0], [1], [0, 0, 1, 1], [], []>} : vector<112x256xf32>, vector<256x196xf32>, vector<112x196xf32> -> vector<112x196xf32>
    %c0_6 = arith.constant 0 : index
    %c256 = arith.constant 256 : index
    %7 = vector.load %arg1[%c0_6, %c256] : memref<112x672xf32, #tpu.memory_space<vmem>>, vector<112x256xf32>
    %c0_7 = arith.constant 0 : index
    %c256_8 = arith.constant 256 : index
    %8 = vector.load %arg2[%c0_7, %c256_8] : memref<1x672xf32, #tpu.memory_space<vmem>>, vector<1x256xf32>
    %9 = vector.broadcast %8 : vector<1x256xf32> to vector<112x256xf32>
    %10 = arith.mulf %7, %9 : vector<112x256xf32>
    %c0_9 = arith.constant 0 : index
    %c256_10 = arith.constant 256 : index
    %c0_11 = arith.constant 0 : index
    %11 = vector.load %arg3[%c0_9, %c256_10, %c0_11] : memref<1x672x196xf32, #tpu.memory_space<vmem>>, vector<1x256x196xf32>
    %12 = vector.shape_cast %11 : vector<1x256x196xf32> to vector<256x196xf32>
    %cst_12 = arith.constant dense<0.000000e+00> : vector<112x196xf32>
    %13 = tpu.matmul %10, %12, %cst_12 {dimension_numbers = #tpu.dot_dimension_numbers<[1], [0], [0], [1], [0, 0, 1, 1], [], []>} : vector<112x256xf32>, vector<256x196xf32>, vector<112x196xf32> -> vector<112x196xf32>
    %14 = arith.addf %6, %13 : vector<112x196xf32>
    %c0_13 = arith.constant 0 : index
    %c512 = arith.constant 512 : index
    %15 = vector.load %arg1[%c0_13, %c512] : memref<112x672xf32, #tpu.memory_space<vmem>>, vector<112x160xf32>
    %c0_14 = arith.constant 0 : index
    %c512_15 = arith.constant 512 : index
    %16 = vector.load %arg2[%c0_14, %c512_15] : memref<1x672xf32, #tpu.memory_space<vmem>>, vector<1x160xf32>
    %17 = vector.broadcast %16 : vector<1x160xf32> to vector<112x160xf32>
    %18 = arith.mulf %15, %17 : vector<112x160xf32>
    %c0_16 = arith.constant 0 : index
    %c512_17 = arith.constant 512 : index
    %c0_18 = arith.constant 0 : index
    %19 = vector.load %arg3[%c0_16, %c512_17, %c0_18] : memref<1x672x196xf32, #tpu.memory_space<vmem>>, vector<1x160x196xf32>
    %20 = vector.shape_cast %19 : vector<1x160x196xf32> to vector<160x196xf32>
    %cst_19 = arith.constant dense<0.000000e+00> : vector<112x196xf32>
    %21 = tpu.matmul %18, %20, %cst_19 {dimension_numbers = #tpu.dot_dimension_numbers<[1], [0], [0], [1], [0, 0, 1, 1], [], []>} : vector<112x160xf32>, vector<160x196xf32>, vector<112x196xf32> -> vector<112x196xf32>
    %22 = arith.addf %14, %21 : vector<112x196xf32>
    %c0_20 = arith.constant 0 : index
    %c0_21 = arith.constant 0 : index
    %c0_22 = arith.constant 0 : index
    %23 = vector.load %arg4[%c0_20, %c0_21, %c0_22] : memref<1x112x196xf32, #tpu.memory_space<vmem>>, vector<1x112x196xf32>
    %24 = vector.shape_cast %23 : vector<1x112x196xf32> to vector<112x196xf32>
    %25 = vector.shape_cast %22 : vector<112x196xf32> to vector<1x112x196xf32>
    tpu.vector_store %arg4[%c0_20, %c0_21, %c0_22], %25 {strides = array<i32>} : memref<1x112x196xf32, #tpu.memory_space<vmem>>, vector<1x112x196xf32>,
    return
  }
  func.func @transform_0(%arg0: i32) -> (i32, i32) {
    %c0_i32 = arith.constant 0 : i32
    %c0_i32_0 = arith.constant 0 : i32
    %c0_i32_1 = arith.constant 0 : i32
    return %c0_i32, %c0_i32_0 : i32, i32
  }
  func.func @transform_1(%arg0: i32) -> (i32, i32) {
    %c0_i32 = arith.constant 0 : i32
    %c0_i32_0 = arith.constant 0 : i32
    %c0_i32_1 = arith.constant 0 : i32
    return %c0_i32, %c0_i32_0 : i32, i32
  }
  func.func @transform_2(%arg0: i32) -> (i32, i32, i32) {
    %c0_i32 = arith.constant 0 : i32
    %c0_i32_0 = arith.constant 0 : i32
    %c0_i32_1 = arith.constant 0 : i32
    return %arg0, %c0_i32, %c0_i32_0 : i32, i32, i32
  }
  func.func @transform_3(%arg0: i32) -> (i32, i32, i32) {
    %c0_i32 = arith.constant 0 : i32
    %c0_i32_0 = arith.constant 0 : i32
    %c0_i32_1 = arith.constant 0 : i32
    return %arg0, %c0_i32, %c0_i32_0 : i32, i32, i32
  }
}

</mosaic_0001>

<bundles_post_ra>
// kernel: tpu_custom_call.1
= control target key start
LH: loop header
LB: loop body
LE: loop exit
PB: predicated region body
PF: predicated region fallthrough
CT: control target
= control target key end

     0   :  { %vm684_vm0 = vcmask 261120   ;;  %vm905_vm1 = vcmask 556032   ;;  %s2422_s2 = inlined_call_operand.vmem [shape: f32[1,672,196], index: 2, kind: input, shape index: {}]   ;;  %s2423_s0 = inlined_call_operand.vmem [shape: f32[112,672], index: 0, kind: input, shape index: {}]   ;;  %s2424_s1 = inlined_call_operand.vmem [shape: f32[1,672], index: 1, kind: input, shape index: {}]   ;;  %s2425_s3 = inlined_call_operand.vmem [shape: f32[1,112,196], index: 3, kind: output, shape index: {}]  }
   0x1   :  { %v215_v0 = vld [vmem:[%s2422_s2 + $0x208] sm:$0xff]  ;;  %v217_v1 = vld [vmem:[%s2422_s2 + $0x218] sm:$0xff]  ;;  %v214_v5 = vld [vmem:[%s2422_s2 + $0x200] sm:$0xff] }
   0x2   :  { %v83_v2 = vld [vmem:[%s2422_s2 + $0x8] sm:$0xff]  ;;  %v951_v3 = vpack.c.bf16 %v217_v1, %v215_v0  ;;  %v85_v4 = vld [vmem:[%s2422_s2 + $0x18] sm:$0xff]  ;;  %v216_v6 = vld [vmem:[%s2422_s2 + $0x210] sm:$0xff] }
   0x3   :  { %v1015_v7 = vpack.c.bf16 %v85_v4, %v83_v2  ;;  %v953_v8 = vpack.c.bf16 %v216_v6, %v214_v5  ;;  %v82_v9 = vld [vmem:[%s2422_s2] sm:$0xff]  ;;  %v84_v10 = vld [vmem:[%s2422_s2 + $0x10] sm:$0xff]  ;;  %v219_v11 = vld [vmem:[%s2422_s2 + $0x228] sm:$0xff] }
   0x4   :  { %952 = vmatprep.subr.bf16.mxu1 %v951_v3  ;;  %v1017_v12 = vpack.c.bf16 %v84_v10, %v82_v9  ;;  %v221_v13 = vld [vmem:[%s2422_s2 + $0x238] sm:$0xff]  ;;  %v87_v14 = vld [vmem:[%s2422_s2 + $0x28] sm:$0xff]  ;;  %v218_v18 = vld [vmem:[%s2422_s2 + $0x220] sm:$0xff] }
   0x5   :  { %v89_v15 = vld [vmem:[%s2422_s2 + $0x38] sm:$0xff]  ;;  %1016 = vmatprep.subr.bf16.mxu0 %v1015_v7  ;;  %954 = vmatpush1.bf16.msra.mxu1 %v953_v8  ;;  %v955_v16 = vpack.c.bf16 %v221_v13, %v219_v11  ;;  %v220_v19 = vld [vmem:[%s2422_s2 + $0x230] sm:$0xff]  ;;  %v86_v20 = vld [vmem:[%s2422_s2 + $0x20] sm:$0xff] }
   0x6   :  { %v1019_v17 = vpack.c.bf16 %v89_v15, %v87_v14  ;;  %1018 = vmatpush1.bf16.msra.mxu0 %v1017_v12  ;;  %v957_v21 = vpack.c.bf16 %v220_v19, %v218_v18  ;;  %v88_v22 = vld [vmem:[%s2422_s2 + $0x30] sm:$0xff]  ;;  %v223_v23 = vld [vmem:[%s2422_s2 + $0x248] sm:$0xff]  ;;  %v225_v24 = vld [vmem:[%s2422_s2 + $0x258] sm:$0xff] }
   0x7   :  { %956 = vmatprep.subr.bf16.mxu1 %v955_v16  ;;  %v1021_v25 = vpack.c.bf16 %v88_v22, %v86_v20  ;;  %v959_v26 = vpack.c.bf16 %v225_v24, %v223_v23  ;;  %v91_v27 = vld [vmem:[%s2422_s2 + $0x48] sm:$0xff]  ;;  %v93_v28 = vld [vmem:[%s2422_s2 + $0x58] sm:$0xff]  ;;  %v222_v29 = vld [vmem:[%s2422_s2 + $0x240] sm:$0xff] }
   0x8   :  { %1020 = vmatprep.subr.bf16.mxu0 %v1019_v17  ;;  %v1023_v30 = vpack.c.bf16 %v93_v28, %v91_v27  ;;  %v224_v31 = vld [vmem:[%s2422_s2 + $0x250] sm:$0xff]  ;;  %v90_v32 = vld [vmem:[%s2422_s2 + $0x40] sm:$0xff]  ;;  %v227_v35 = vld [vmem:[%s2422_s2 + $0x268] sm:$0xff] }
   0x9   :  { %v92_v33 = vld [vmem:[%s2422_s2 + $0x50] sm:$0xff]  ;;  %958 = vmatpush1.bf16.msra.mxu1 %v957_v21  ;;  %v961_v34 = vpack.c.bf16 %v224_v31, %v222_v29  ;;  %v229_v36 = vld [vmem:[%s2422_s2 + $0x278] sm:$0xff]  ;;  %v95_v37 = vld [vmem:[%s2422_s2 + $0x68] sm:$0xff] }
   0xa   :  { %1022 = vmatpush1.bf16.msra.mxu0 %v1021_v25  ;;  %960 = vmatprep.subr.bf16.mxu1 %v959_v26  ;;  %v1025_v38 = vpack.c.bf16 %v92_v33, %v90_v32  ;;  %v963_v39 = vpack.c.bf16 %v229_v36, %v227_v35  ;;  %v97_v40 = vld [vmem:[%s2422_s2 + $0x78] sm:$0xff]  ;;  %v226_v41 = vld [vmem:[%s2422_s2 + $0x260] sm:$0xff]  ;;  %v228_v42 = vld [vmem:[%s2422_s2 + $0x270] sm:$0xff] }
   0xb   :  { %1024 = vmatprep.subr.bf16.mxu0 %v1023_v30  ;;  %v1027_v43 = vpack.c.bf16 %v97_v40, %v95_v37  ;;  %v94_v44 = vld [vmem:[%s2422_s2 + $0x60] sm:$0xff]  ;;  %v96_v45 = vld [vmem:[%s2422_s2 + $0x70] sm:$0xff]  ;;  %v231_v46 = vld [vmem:[%s2422_s2 + $0x288] sm:$0xff]  ;;  %v965_v50 = vpack.c.bf16 %v228_v42, %v226_v41 }
   0xc   :  { %v233_v47 = vld [vmem:[%s2422_s2 + $0x298] sm:$0xff]  ;;  %v99_v48 = vld [vmem:[%s2422_s2 + $0x88] sm:$0xff]  ;;  %v1029_v51 = vpack.c.bf16 %v96_v45, %v94_v44  ;;  %v230_v53 = vld [vmem:[%s2422_s2 + $0x280] sm:$0xff] }
   0xd   :  { %v101_v49 = vld [vmem:[%s2422_s2 + $0x98] sm:$0xff]  ;;  %962 = vmatpush1.bf16.msra.mxu1 %v961_v34  ;;  %v967_v52 = vpack.c.bf16 %v233_v47, %v231_v46  ;;  %v232_v54 = vld [vmem:[%s2422_s2 + $0x290] sm:$0xff]  ;;  %v98_v55 = vld [vmem:[%s2422_s2 + $0x80] sm:$0xff]  ;;  %v44_v47 = vlaneseq }
   0xe   :  { %1026 = vmatpush1.bf16.msra.mxu0 %v1025_v38  ;;  %964 = vmatprep.subr.bf16.mxu1 %v963_v39  ;;  %v1031_v56 = vpack.c.bf16 %v101_v49, %v99_v48  ;;  %v100_v57 = vld [vmem:[%s2422_s2 + $0x90] sm:$0xff]  ;;  %v235_v58 = vld [vmem:[%s2422_s2 + $0x2a8] sm:$0xff]  ;;  %v237_v59 = vld [vmem:[%s2422_s2 + $0x2b8] sm:$0xff]  ;;  %v969_v62 = vpack.c.bf16 %v232_v54, %v230_v53 }
   0xf   :  { %1028 = vmatprep.subr.bf16.mxu0 %v1027_v43  ;;  %v103_v60 = vld [vmem:[%s2422_s2 + $0xa8] sm:$0xff]  ;;  %v105_v61 = vld [vmem:[%s2422_s2 + $0xb8] sm:$0xff]  ;;  %v1033_v63 = vpack.c.bf16 %v100_v57, %v98_v55  ;;  %v971_v0 = vpack.c.bf16 %v237_v59, %v235_v58  ;;  %v234_v1 = vld [vmem:[%s2422_s2 + $0x2a0] sm:$0xff] }
  0x10   :  { %v236_v2 = vld [vmem:[%s2422_s2 + $0x2b0] sm:$0xff]  ;;  %v102_v3 = vld [vmem:[%s2422_s2 + $0xa0] sm:$0xff]  ;;  %v1035_v4 = vpack.c.bf16 %v105_v61, %v103_v60  ;;  %v239_v6 = vld [vmem:[%s2422_s2 + $0x2c8] sm:$0xff]  ;;  %v1467_v60 = vshrl.u32 %v44_v47, 7 }
  0x11   :  { %966 = vmatpush1.bf16.msra.mxu1 %v965_v50  ;;  %v104_v5 = vld [vmem:[%s2422_s2 + $0xb0] sm:$0xff]  ;;  %v241_v7 = vld [vmem:[%s2422_s2 + $0x2d8] sm:$0xff]  ;;  %v107_v8 = vld [vmem:[%s2422_s2 + $0xc8] sm:$0xff]  ;;  %v973_v10 = vpack.c.bf16 %v236_v2, %v234_v1 }
  0x12   :  { %1030 = vmatpush1.bf16.msra.mxu0 %v1029_v51  ;;  %968 = vmatprep.subr.bf16.mxu1 %v967_v52  ;;  %v109_v9 = vld [vmem:[%s2422_s2 + $0xd8] sm:$0xff]  ;;  %v1037_v11 = vpack.c.bf16 %v104_v5, %v102_v3  ;;  %v975_v12 = vpack.c.bf16 %v241_v7, %v239_v6  ;;  %v238_v13 = vld [vmem:[%s2422_s2 + $0x2c0] sm:$0xff]  ;;  %v240_v14 = vld [vmem:[%s2422_s2 + $0x2d0] sm:$0xff] }
  0x13   :  { %1032 = vmatprep.subr.bf16.mxu0 %v1031_v56  ;;  %v106_v15 = vld [vmem:[%s2422_s2 + $0xc0] sm:$0xff]  ;;  %v1039_v16 = vpack.c.bf16 %v109_v9, %v107_v8  ;;  %v108_v17 = vld [vmem:[%s2422_s2 + $0xd0] sm:$0xff]  ;;  %v243_v18 = vld [vmem:[%s2422_s2 + $0x2e8] sm:$0xff]  ;;  %v977_v22 = vpack.c.bf16 %v240_v14, %v238_v13 }
  0x14   :  { %v245_v19 = vld [vmem:[%s2422_s2 + $0x2f8] sm:$0xff]  ;;  %v111_v20 = vld [vmem:[%s2422_s2 + $0xe8] sm:$0xff]  ;;  %v1041_v23 = vpack.c.bf16 %v108_v17, %v106_v15  ;;  %v242_v25 = vld [vmem:[%s2422_s2 + $0x2e0] sm:$0xff] }
  0x15   :  { %970 = vmatpush1.bf16.msra.mxu1 %v969_v62  ;;  %v113_v21 = vld [vmem:[%s2422_s2 + $0xf8] sm:$0xff]  ;;  %v979_v24 = vpack.c.bf16 %v245_v19, %v243_v18  ;;  %v244_v26 = vld [vmem:[%s2422_s2 + $0x2f0] sm:$0xff]  ;;  %v110_v27 = vld [vmem:[%s2422_s2 + $0xe0] sm:$0xff] }
  0x16   :  { %1034 = vmatpush1.bf16.msra.mxu0 %v1033_v63  ;;  %972 = vmatprep.subr.bf16.mxu1 %v971_v0  ;;  %v1043_v28 = vpack.c.bf16 %v113_v21, %v111_v20  ;;  %v112_v29 = vld [vmem:[%s2422_s2 + $0xf0] sm:$0xff]  ;;  %v247_v30 = vld [vmem:[%s2422_s2 + $0x308] sm:$0xff]  ;;  %v249_v31 = vld [vmem:[%s2422_s2 + $0x318] sm:$0xff]  ;;  %v981_v34 = vpack.c.bf16 %v244_v26, %v242_v25 }
  0x17   :  { %1036 = vmatprep.subr.bf16.mxu0 %v1035_v4  ;;  %v115_v32 = vld [vmem:[%s2422_s2 + $0x108] sm:$0xff]  ;;  %v117_v33 = vld [vmem:[%s2422_s2 + $0x118] sm:$0xff]  ;;  %v1045_v35 = vpack.c.bf16 %v112_v29, %v110_v27  ;;  %v983_v36 = vpack.c.bf16 %v249_v31, %v247_v30  ;;  %v246_v37 = vld [vmem:[%s2422_s2 + $0x300] sm:$0xff] }
  0x18   :  { %v248_v38 = vld [vmem:[%s2422_s2 + $0x310] sm:$0xff]  ;;  %v114_v39 = vld [vmem:[%s2422_s2 + $0x100] sm:$0xff]  ;;  %v1047_v40 = vpack.c.bf16 %v117_v33, %v115_v32  ;;  %v251_v42 = vld [vmem:[%s2422_s2 + $0x328] sm:$0xff] }
  0x19   :  { %974 = vmatpush1.bf16.msra.mxu1 %v973_v10  ;;  %v116_v41 = vld [vmem:[%s2422_s2 + $0x110] sm:$0xff]  ;;  %v253_v43 = vld [vmem:[%s2422_s2 + $0x338] sm:$0xff]  ;;  %v119_v44 = vld [vmem:[%s2422_s2 + $0x128] sm:$0xff]  ;;  %v985_v46 = vpack.c.bf16 %v248_v38, %v246_v37 }
  0x1a   :  { %1038 = vmatpush1.bf16.msra.mxu0 %v1037_v11  ;;  %976 = vmatprep.subr.bf16.mxu1 %v975_v12  ;;  %v121_v45 = vld [vmem:[%s2422_s2 + $0x138] sm:$0xff]  ;;  %v1049_v48 = vpack.c.bf16 %v116_v41, %v114_v39  ;;  %v987_v49 = vpack.c.bf16 %v253_v43, %v251_v42  ;;  %v250_v50 = vld [vmem:[%s2422_s2 + $0x320] sm:$0xff]  ;;  %v252_v51 = vld [vmem:[%s2422_s2 + $0x330] sm:$0xff]  ;;  %v50_v11 = vsub.s32 1, %v1467_v60 }
  0x1b   :  { %1040 = vmatprep.subr.bf16.mxu0 %v1039_v16  ;;  %v118_v52 = vld [vmem:[%s2422_s2 + $0x120] sm:$0xff]  ;;  %v1051_v53 = vpack.c.bf16 %v121_v45, %v119_v44  ;;  %v120_v54 = vld [vmem:[%s2422_s2 + $0x130] sm:$0xff]  ;;  %v255_v55 = vld [vmem:[%s2422_s2 + $0x348] sm:$0xff]  ;;  %v989_v59 = vpack.c.bf16 %v252_v51, %v250_v50 }
  0x1c   :  { %v257_v56 = vld [vmem:[%s2422_s2 + $0x358] sm:$0xff]  ;;  %v123_v57 = vld [vmem:[%s2422_s2 + $0x148] sm:$0xff]  ;;  %v1053_v61 = vpack.c.bf16 %v120_v54, %v118_v52  ;;  %v254_v63 = vld [vmem:[%s2422_s2 + $0x340] sm:$0xff] }
  0x1d   :  { %978 = vmatpush1.bf16.msra.mxu1 %v977_v22  ;;  %v125_v58 = vld [vmem:[%s2422_s2 + $0x158] sm:$0xff]  ;;  %v991_v62 = vpack.c.bf16 %v257_v56, %v255_v55  ;;  %v256_v0 = vld [vmem:[%s2422_s2 + $0x350] sm:$0xff]  ;;  %v122_v1 = vld [vmem:[%s2422_s2 + $0x140] sm:$0xff] }
  0x1e   :  { %1042 = vmatpush1.bf16.msra.mxu0 %v1041_v23  ;;  %980 = vmatprep.subr.bf16.mxu1 %v979_v24  ;;  %v1055_v2 = vpack.c.bf16 %v125_v58, %v123_v57  ;;  %v124_v3 = vld [vmem:[%s2422_s2 + $0x150] sm:$0xff]  ;;  %v259_v4 = vld [vmem:[%s2422_s2 + $0x368] sm:$0xff]  ;;  %v261_v5 = vld [vmem:[%s2422_s2 + $0x378] sm:$0xff]  ;;  %v993_v8 = vpack.c.bf16 %v256_v0, %v254_v63 }
  0x1f   :  { %1044 = vmatprep.subr.bf16.mxu0 %v1043_v28  ;;  %v127_v6 = vld [vmem:[%s2422_s2 + $0x168] sm:$0xff]  ;;  %v129_v7 = vld [vmem:[%s2422_s2 + $0x178] sm:$0xff]  ;;  %v258_v9 = vld [vmem:[%s2422_s2 + $0x360] sm:$0xff]  ;;  %v1057_v12 = vpack.c.bf16 %v124_v3, %v122_v1  ;;  %v995_v13 = vpack.c.bf16 %v261_v5, %v259_v4  ;;  %v46_v4 = vsub.s32 0, %v1467_v60 }
  0x20   :  { %v260_v10 = vld [vmem:[%s2422_s2 + $0x370] sm:$0xff]  ;;  %v126_v14 = vld [vmem:[%s2422_s2 + $0x160] sm:$0xff]  ;;  %v263_v16 = vld [vmem:[%s2422_s2 + $0x388] sm:$0xff]  ;;  %v1059_v17 = vpack.c.bf16 %v129_v7, %v127_v6 }
  0x21   :  { %982 = vmatpush1.bf16.msra.mxu1 %v981_v34  ;;  %v128_v15 = vld [vmem:[%s2422_s2 + $0x170] sm:$0xff]  ;;  %v265_v18 = vld [vmem:[%s2422_s2 + $0x398] sm:$0xff]  ;;  %v131_v19 = vld [vmem:[%s2422_s2 + $0x188] sm:$0xff]  ;;  %v997_v24 = vpack.c.bf16 %v260_v10, %v258_v9 }
  0x22   :  { %1046 = vmatpush1.bf16.msra.mxu0 %v1045_v35  ;;  %984 = vmatprep.subr.bf16.mxu1 %v983_v36  ;;  %v133_v20 = vld [vmem:[%s2422_s2 + $0x198] sm:$0xff]  ;;  %v1524_v22 = vld [vmem:[%s2424_s1 + $0x2] sm:$0x3]  ;;  %v1529_v23 = vld [vmem:[%s2424_s1 + $0x4] sm:$0x3]  ;;  %v1061_v29 = vpack.c.bf16 %v128_v15, %v126_v14  ;;  %v999_v30 = vpack.c.bf16 %v265_v18, %v263_v16 }
  0x23   :  { %1048 = vmatprep.subr.bf16.mxu0 %v1047_v40  ;;  %v147_v21 = vld [vmem:[%s2423_s0 + $0x18] sm:$0xff]  ;;  %v1532_v25 = vrot.slane %v1524_v22, %v50_v11  ;;  %v1535_v26 = vrot.slane %v1529_v23, %v50_v11  ;;  %v15_v27 = vld [vmem:[%s2423_s0 + $0x8] sm:$0xff]  ;;  %v1543_v28 = vld [vmem:[%s2424_s1] sm:$0x3]  ;;  %v1063_v35 = vpack.c.bf16 %v133_v20, %v131_v19  ;;  %v1642_v14 = vrot.slane %v1524_v22, %v46_v4 }
  0x24   :  { %v262_v31 = vld [vmem:[%s2422_s2 + $0x380] sm:$0xff]  ;;  %v264_v32 = vld [vmem:[%s2422_s2 + $0x390] sm:$0xff]  ;;  %v1555_v34 = vrot.slane %v1543_v28, %v50_v11  ;;  %v267_v37 = vld [vmem:[%s2422_s2 + $0x3a8] sm:$0xff]  ;;  %v1654_v19 = vrot.slane %v1543_v28, %v46_v4 }
  0x25   :  { %986 = vmatpush1.bf16.msra.mxu1 %v985_v46  ;;  %v130_v33 = vld [vmem:[%s2422_s2 + $0x180] sm:$0xff]  ;;  %v132_v36 = vld [vmem:[%s2422_s2 + $0x190] sm:$0xff]  ;;  %v269_v38 = vld [vmem:[%s2422_s2 + $0x3b8] sm:$0xff]  ;;  %v187_v39 = vmul.f32 %v1532_v25, %v147_v21  ;;  %v1001_v43 = vpack.c.bf16 %v264_v32, %v262_v31 }
  0x26   :  { %1050 = vmatpush1.bf16.msra.mxu0 %v1049_v48  ;;  %988 = vmatprep.subr.bf16.mxu1 %v987_v49  ;;  %v135_v40 = vld [vmem:[%s2422_s2 + $0x1a8] sm:$0xff]  ;;  %v137_v41 = vld [vmem:[%s2422_s2 + $0x1b8] sm:$0xff]  ;;  %v55_v42 = vmul.f32 %v1555_v34, %v15_v27  ;;  %v1065_v44 = vpack.c.bf16 %v132_v36, %v130_v33  ;;  %v1003_v45 = vpack.c.bf16 %v269_v38, %v267_v37  ;;  %v266_v46 = vld [vmem:[%s2422_s2 + $0x3a0] sm:$0xff] }
  0x27   :  { %1052 = vmatprep.subr.bf16.mxu0 %v1051_v53  ;;  %342 = vmatprep.mubr.f32.mxu1 %v187_v39  ;;  %v268_v47 = vld [vmem:[%s2422_s2 + $0x3b0] sm:$0xff]  ;;  %v134_v48 = vld [vmem:[%s2422_s2 + $0x1a0] sm:$0xff]  ;;  %v1067_v49 = vpack.c.bf16 %v137_v41, %v135_v40  ;;  %v271_v51 = vld [vmem:[%s2422_s2 + $0x3c8] sm:$0xff] }
  0x28   :  { %v136_v50 = vld [vmem:[%s2422_s2 + $0x1b0] sm:$0xff]  ;;  %v273_v52 = vld [vmem:[%s2422_s2 + $0x3d8] sm:$0xff]  ;;  %491 = vmatprep.mubr.f32.mxu0 %v55_v42  ;;  %v139_v53 = vld [vmem:[%s2422_s2 + $0x1c8] sm:$0xff]  ;;  %v1005_v55 = vpack.c.bf16 %v268_v47, %v266_v46 }
  0x29   :  { %990 = vmatpush1.bf16.msra.mxu1 %v989_v59  ;;  %v141_v54 = vld [vmem:[%s2422_s2 + $0x1d8] sm:$0xff]  ;;  %v1069_v56 = vpack.c.bf16 %v136_v50, %v134_v48  ;;  %v1007_v57 = vpack.c.bf16 %v273_v52, %v271_v51  ;;  %v270_v58 = vld [vmem:[%s2422_s2 + $0x3c0] sm:$0xff]  ;;  %v272_v59 = vld [vmem:[%s2422_s2 + $0x3d0] sm:$0xff]  ;;  %v1716_v48 = vrot.slane %v1529_v23, %v46_v4 }
  0x2a   :  { %1054 = vmatpush1.bf16.msra.mxu0 %v1053_v61  ;;  %992 = vmatprep.subr.bf16.mxu1 %v991_v62  ;;  %v138_v61 = vld [vmem:[%s2422_s2 + $0x1c0] sm:$0xff]  ;;  %v1071_v62 = vpack.c.bf16 %v141_v54, %v139_v53  ;;  %v140_v63 = vld [vmem:[%s2422_s2 + $0x1d0] sm:$0xff]  ;;  %v275_v0 = vld [vmem:[%s2422_s2 + $0x3e8] sm:$0xff]  ;;  %v1009_v5 = vpack.c.bf16 %v272_v59, %v270_v58 }
  0x2b   :  { %1056 = vmatprep.subr.bf16.mxu0 %v1055_v2  ;;  %v277_v1 = vld [vmem:[%s2422_s2 + $0x3f8] sm:$0xff]  ;;  %v143_v2 = vld [vmem:[%s2422_s2 + $0x1e8] sm:$0xff]  ;;  %v1073_v6 = vpack.c.bf16 %v140_v63, %v138_v61  ;;  %v276_v9 = vld [vmem:[%s2422_s2 + $0x3f0] sm:$0xff] }
  0x2c   :  { %v145_v3 = vld [vmem:[%s2422_s2 + $0x1f8] sm:$0xff]  ;;  %v1011_v7 = vpack.c.bf16 %v277_v1, %v275_v0  ;;  %v142_v10 = vld [vmem:[%s2422_s2 + $0x1e0] sm:$0xff]  ;;  %v144_v11 = vld [vmem:[%s2422_s2 + $0x1f0] sm:$0xff] }
  0x2d   :  { %994 = vmatpush1.bf16.msra.mxu1 %v993_v8  ;;  %v274_v8 = vld [vmem:[%s2422_s2 + $0x3e0] sm:$0xff]  ;;  %v1075_v60 = vpack.c.bf16 %v145_v3, %v143_v2  ;;  %v146_v15 = vld [vmem:[%s2423_s0 + $0x10] sm:$0xff]  ;;  %v149_v21 = vld [vmem:[%s2423_s0 + $0x48] sm:$0xff] }
  0x2e   :  { %1058 = vmatpush1.bf16.msra.mxu0 %v1057_v12  ;;  %996 = vmatprep.subr.bf16.mxu1 %v995_v13  ;;  %v645_v12 = vld [vmem:[%s2422_s2 + $0x408] sm:$0xff]  ;;  %v647_v13 = vld [vmem:[%s2422_s2 + $0x418] sm:$0xff]  ;;  %v14_v16 = vld [vmem:[%s2423_s0] sm:$0xff]  ;;  %v1013_v18 = vpack.c.bf16 %v276_v9, %v274_v8  ;;  %v186_v39 = vmul.f32 %v1642_v14, %v146_v15 }
  0x2f   :  { %1060 = vmatprep.subr.bf16.mxu0 %v1059_v17  ;;  %v644_v17 = vld [vmem:[%s2422_s2 + $0x400] sm:$0xff]  ;;  %v646_v20 = vld [vmem:[%s2422_s2 + $0x410] sm:$0xff]  ;;  %v17_v22 = vld [vmem:[%s2423_s0 + $0x38] sm:$0xff]  ;;  %v1079_v27 = vpack.c.bf16 %v647_v13, %v645_v12 }
  0x30   :  { %v148_v28 = vld [vmem:[%s2423_s0 + $0x40] sm:$0xff]  ;;  %v651_v31 = vld [vmem:[%s2422_s2 + $0x438] sm:$0xff]  ;;  %v19_v33 = vld [vmem:[%s2423_s0 + $0x68] sm:$0xff]  ;;  %v57_v50 = vmul.f32 %v1555_v34, %v17_v22 }
  0x31   :  { %998 = vmatpush1.bf16.msra.mxu1 %v997_v24  ;;  %v1077_v24 = vpack.c.bf16 %v144_v11, %v142_v10  ;;  %v151_v32 = vld [vmem:[%s2423_s0 + $0x78] sm:$0xff]  ;;  %v650_v36 = vld [vmem:[%s2422_s2 + $0x430] sm:$0xff]  ;;  %v18_v38 = vld [vmem:[%s2423_s0 + $0x60] sm:$0xff]  ;;  %v188_v23 = vmul.f32 %v1642_v14, %v148_v28  ;;  %v59_v61 = vmul.f32 %v1555_v34, %v19_v33 }
  0x32   :  { %1062 = vmatpush1.bf16.msra.mxu0 %v1061_v29  ;;  %1000 = vmatprep.subr.bf16.mxu1 %v999_v30  ;;  %v16_v29 = vld [vmem:[%s2423_s0 + $0x30] sm:$0xff]  ;;  %v649_v30 = vld [vmem:[%s2422_s2 + $0x428] sm:$0xff]  ;;  %v21_v41 = vld [vmem:[%s2423_s0 + $0x98] sm:$0xff]  ;;  %v1744_v0 = vmul.f32 %v1654_v19, %v18_v38 }
  0x33   :  { %1064 = vmatprep.subr.bf16.mxu0 %v1063_v35  ;;  %v648_v35 = vld [vmem:[%s2422_s2 + $0x420] sm:$0xff]  ;;  %v150_v37 = vld [vmem:[%s2423_s0 + $0x70] sm:$0xff]  ;;  %v153_v40 = vld [vmem:[%s2423_s0 + $0xa8] sm:$0xff]  ;;  %v56_v54 = vmul.f32 %v1654_v19, %v16_v29 }
  0x34   :  { %v152_v42 = vld [vmem:[%s2423_s0 + $0xa0] sm:$0xff]  ;;  %v653_v46 = vld [vmem:[%s2422_s2 + $0x448] sm:$0xff]  ;;  %v655_v47 = vld [vmem:[%s2422_s2 + $0x458] sm:$0xff]  ;;  %v190_v63 = vmul.f32 %v1642_v14, %v150_v37  ;;  %v193_v4 = vmul.f32 %v1532_v25, %v153_v40 }
  0x35   :  { %1002 = vmatpush1.bf16.msra.mxu1 %v1001_v43  ;;  %v54_v43 = vmul.f32 %v1654_v19, %v14_v16  ;;  %v652_v51 = vld [vmem:[%s2422_s2 + $0x440] sm:$0xff]  ;;  %v654_v52 = vld [vmem:[%s2422_s2 + $0x450] sm:$0xff]  ;;  %v155_v53 = vld [vmem:[%s2423_s0 + $0xd8] sm:$0xff] }
  0x36   :  { %1066 = vmatpush1.bf16.msra.mxu0 %v1065_v44  ;;  %1004 = vmatprep.subr.bf16.mxu1 %v1003_v45  ;;  %v1081_v44 = vpack.c.bf16 %v646_v20, %v644_v17  ;;  %v20_v45 = vld [vmem:[%s2423_s0 + $0x90] sm:$0xff]  ;;  %v22_v59 = vld [vmem:[%s2423_s0 + $0xc0] sm:$0xff]  ;;  %v657_v1 = vld [vmem:[%s2422_s2 + $0x468] sm:$0xff]  ;;  %v1774_v11 = vpack.c.bf16 %v654_v52, %v652_v51  ;;  %v1786_v16 = vmul.f32 %v1532_v25, %v155_v53 }
  0x37   :  { %1068 = vmatprep.subr.bf16.mxu0 %v1067_v49  ;;  %v189_v49 = vmul.f32 %v1532_v25, %v149_v21  ;;  %v154_v58 = vld [vmem:[%s2423_s0 + $0xd0] sm:$0xff]  ;;  %v659_v2 = vld [vmem:[%s2422_s2 + $0x478] sm:$0xff]  ;;  %v656_v3 = vld [vmem:[%s2422_s2 + $0x460] sm:$0xff]  ;;  %v1772_v10 = vmul.f32 %v1654_v19, %v20_v45 }
  0x38   :  { %v157_v8 = vld [vmem:[%s2423_s0 + $0x108] sm:$0xff]  ;;  %v25_v9 = vld [vmem:[%s2423_s0 + $0xf8] sm:$0xff]  ;;  %v156_v12 = vld [vmem:[%s2423_s0 + $0x100] sm:$0xff]  ;;  %v1091_v28 = vpack.c.bf16 %v659_v2, %v657_v1 }
  0x39   :  { %1006 = vmatpush1.bf16.msra.mxu1 %v1005_v55  ;;  %v1083_v55 = vpack.c.bf16 %v651_v31, %v649_v30  ;;  %v24_v13 = vld [vmem:[%s2423_s0 + $0xf0] sm:$0xff]  ;;  %v159_v15 = vld [vmem:[%s2423_s0 + $0x138] sm:$0xff]  ;;  %v27_v20 = vld [vmem:[%s2423_s0 + $0x128] sm:$0xff]  ;;  %v1821_v33 = vmul.f32 %v1532_v25, %v157_v8  ;;  %v1839_v40 = vmul.f32 %v1642_v14, %v156_v12 }
  0x3a   :  { %1070 = vmatpush1.bf16.msra.mxu0 %v1069_v56  ;;  %1008 = vmatprep.subr.bf16.mxu1 %v1007_v57  ;;  %v191_v56 = vmul.f32 %v1532_v25, %v151_v32  ;;  %v23_v57 = vld [vmem:[%s2423_s0 + $0xc8] sm:$0xff]  ;;  %v663_v22 = vld [vmem:[%s2422_s2 + $0x498] sm:$0xff]  ;;  %v662_v30 = vld [vmem:[%s2422_s2 + $0x490] sm:$0xff] }
  0x3b   :  { %1072 = vmatprep.subr.bf16.mxu0 %v1071_v62  ;;  %v1085_v62 = vpack.c.bf16 %v650_v36, %v648_v35  ;;  %v1789_v17 = vmul.f32 %v1555_v34, %v23_v57  ;;  %v661_v21 = vld [vmem:[%s2422_s2 + $0x488] sm:$0xff]  ;;  %v171_v32 = vld [vmem:[%s2423_s0 + $0x258] sm:$0xff]  ;;  %v1824_v35 = vmul.f32 %v1555_v34, %v25_v9  ;;  %v664_v37 = vld [vmem:[%s2422_s2 + $0x4a0] sm:$0xff] }
  0x3c   :  { %v665_v31 = vld [vmem:[%s2422_s2 + $0x4a8] sm:$0xff]  ;;  %v667_v36 = vld [vmem:[%s2422_s2 + $0x4b8] sm:$0xff]  ;;  %v1833_v38 = vmul.f32 %v1532_v25, %v171_v32  ;;  %v1095_v51 = vpack.c.bf16 %v663_v22, %v661_v21  ;;  %v576_v57 = vld [vmem:[%s2423_s0 + $0x20] sm:$0xff] }
  0x3d   :  { %1010 = vmatpush1.bf16.msra.mxu1 %v1009_v5  ;;  %v1757_v5 = vmul.f32 %v1555_v34, %v21_v41  ;;  %v1842_v41 = vmul.f32 %v1654_v19, %v24_v13  ;;  %v41_v45 = vld [vmem:[%s2423_s0 + $0x278] sm:$0xff]  ;;  %v577_v53 = vld [vmem:[%s2423_s0 + $0x28] sm:$0xff]  ;;  %v578_v1 = vld [vmem:[%s2423_s0 + $0x50] sm:$0xff] }
  0x3e   :  { %1074 = vmatpush1.bf16.msra.mxu0 %v1073_v6  ;;  %1012 = vmatprep.subr.bf16.mxu1 %v1011_v7  ;;  %v1760_v6 = vmul.f32 %v1642_v14, %v152_v42  ;;  %v658_v7 = vld [vmem:[%s2422_s2 + $0x470] sm:$0xff]  ;;  %v595_v8 = vld [vmem:[%s2423_s0 + $0x1d8] sm:$0xff]  ;;  %v580_v12 = vld [vmem:[%s2423_s0 + $0x80] sm:$0xff] }
  0x3f   :  { %1076 = vmatprep.subr.bf16.mxu0 %v1075_v60  ;;  %v1087_v60 = vpack.c.bf16 %v655_v47, %v653_v46  ;;  %v1809_v29 = vpack.c.bf16 %v658_v7, %v656_v3  ;;  %v666_v42 = vld [vmem:[%s2422_s2 + $0x4b0] sm:$0xff]  ;;  %v1857_v46 = vmul.f32 %v1532_v25, %v159_v15  ;;  %v581_v7 = vld [vmem:[%s2423_s0 + $0x88] sm:$0xff]  ;;  %v1951_v15 = vmul.f32 %v1716_v48, %v580_v12  ;;  %v588_v12 = vld [vmem:[%s2423_s0 + $0x140] sm:$0xff] }
  0x40   :  { %v594_v13 = vld [vmem:[%s2423_s0 + $0x1d0] sm:$0xff]  ;;  %v597_v22 = vld [vmem:[%s2423_s0 + $0x208] sm:$0xff] }
  0x41   :  { %1014 = vmatpush1.bf16.msra.mxu1 %v1013_v18  ;;  %v1792_v18 = vmul.f32 %v1642_v14, %v154_v58  ;;  %v590_v58 = vld [vmem:[%s2423_s0 + $0x170] sm:$0xff] }
  0x42   :  { %1078 = vmatpush1.bf16.msra.mxu0 %v1077_v24  ;;  %1119 = vmatprep.subr.bf16.mxu1 %v1079_v27  ;;  %v660_v24 = vld [vmem:[%s2422_s2 + $0x480] sm:$0xff] }
  0x43   :  { %1080 = vmatprep.subr.bf16.mxu0 %v1079_v27  ;;  %v1807_v27 = vmul.f32 %v1654_v19, %v22_v59  ;;  %v1868_v52 = vpack.c.bf16 %v662_v30, %v660_v24  ;;  %v582_v24 = vld [vmem:[%s2423_s0 + $0xb0] sm:$0xff]  ;;  %v1977_v30 = vmul.f32 %v1535_v26, %v597_v22  ;;  %v2067_v22 = vmul.f32 %v1716_v48, %v588_v12 }
  0x44   :  { %343 = vmatmul.mubr.f32.vlgmr.msra.gmra.mrb[0].mxu1 %v186_v39  ;;  %v39_v39 = vld [vmem:[%s2423_s0 + $0x248] sm:$0xff] }
  0x45   :  { %492 = vmatmul.mubr.f32.vlgmr.msra.gmra.mrb[0].mxu0 %v54_v43  ;;  %1129 = vmatpush1.bf16.msra.mxu1 %v1081_v44  ;;  %v1848_v43 = vmul.f32 %v1555_v34, %v39_v39  ;;  %v158_v39 = vld [vmem:[%s2423_s0 + $0x130] sm:$0xff] }
  0x46   :  { %1082 = vmatpush1.bf16.msra.mxu0 %v1081_v44  ;;  %348 = vmatprep.mubr.f32.mxu1 %v189_v49  ;;  %v173_v44 = vld [vmem:[%s2423_s0 + $0x288] sm:$0xff]  ;;  %v1863_v49 = vmul.f32 %v1555_v34, %v41_v45 }
  0x47   :  { %497 = vmatprep.mubr.f32.mxu0 %v57_v50  ;;  %1084 = vmatprep.subr.bf16.mxu0 %v1083_v55  ;;  %v1860_v47 = vmul.f32 %v1532_v25, %v173_v44  ;;  %v1866_v50 = vmul.f32 %v1555_v34, %v27_v20  ;;  %v1954_v20 = vmul.f32 %v1716_v48, %v594_v13  ;;  %v161_v13 = vld [vmem:[%s2423_s0 + $0x168] sm:$0xff] }
  0x48   :  { %349 = vmatmul.mubr.f32.gmra.mrb[2].mxu1 %v188_v23  ;;  %1120 = vmatprep.subr.bf16.mxu1 %v1083_v55  ;;  %v1874_v23 = vpack.c.bf16 %v667_v36, %v665_v31  ;;  %v1879_v55 = vmul.f32 %v1535_v26, %v577_v53  ;;  %v1980_v31 = vmul.f32 %v1716_v48, %v582_v24  ;;  %v599_v36 = vld [vmem:[%s2423_s0 + $0x238] sm:$0xff]  ;;  %v598_v53 = vld [vmem:[%s2423_s0 + $0x230] sm:$0xff] }
  0x49   :  { %498 = vmatmul.mubr.f32.gmra.mrb[2].mxu0 %v56_v54  ;;  %354 = vmatprep.mubr.f32.mxu1 %v191_v56  ;;  %v1876_v54 = vpack.c.bf16 %v666_v42, %v664_v37  ;;  %v591_v56 = vld [vmem:[%s2423_s0 + $0x178] sm:$0xff]  ;;  %v584_v37 = vld [vmem:[%s2423_s0 + $0xe0] sm:$0xff]  ;;  %v2002_v44 = vmul.f32 %v1535_v26, %v599_v36 }
  0x4a   :  { %503 = vmatprep.mubr.f32.mxu0 %v59_v61  ;;  %1086 = vmatpush1.bf16.msra.mxu0 %v1085_v62  ;;  %v1893_v59 = vmul.f32 %v1535_v26, %v591_v56  ;;  %v1896_v61 = vmul.f32 %v1716_v48, %v576_v57  ;;  %v2005_v45 = vmul.f32 %v1716_v48, %v584_v37  ;;  %v601_v56 = vld [vmem:[%s2423_s0 + $0x268] sm:$0xff]  ;;  %v28_v37 = vld [vmem:[%s2423_s0 + $0x150] sm:$0xff] }
  0x4b   :  { %1130 = vmatpush1.bf16.msra.mxu1 %v1085_v62  ;;  %1088 = vmatprep.subr.bf16.mxu0 %v1087_v60  ;;  %v1899_v62 = vmul.f32 %v1716_v48, %v590_v58  ;;  %v2018_v57 = vmul.f32 %v1716_v48, %v598_v53  ;;  %v672_v53 = vld [vmem:[%s2422_s2 + $0x4e0] sm:$0xff] }
  0x4c   :  { %355 = vmatmul.mubr.f32.gmra.mrb[4].mxu1 %v190_v63  ;;  %1121 = vmatprep.subr.bf16.mxu1 %v1087_v60  ;;  %v579_v63 = vld [vmem:[%s2423_s0 + $0x58] sm:$0xff]  ;;  %v1934_v60 = vmul.f32 %v1535_v26, %v581_v7 }
  0x4d   :  { %504 = vmatmul.mubr.f32.gmra.mrb[4].mxu0 %v1744_v0  ;;  %360 = vmatprep.mubr.f32.mxu1 %v193_v4  ;;  %v593_v0 = vld [vmem:[%s2423_s0 + $0x1a8] sm:$0xff]  ;;  %v1912_v2 = vmul.f32 %v1535_v26, %v579_v63  ;;  %v1918_v4 = vmul.f32 %v1716_v48, %v578_v1  ;;  %v2024_v63 = vmul.f32 %v1535_v26, %v601_v56  ;;  %v600_v1 = vld [vmem:[%s2423_s0 + $0x260] sm:$0xff] }
  0x4e   :  { %509 = vmatprep.mubr.f32.mxu0 %v1757_v5  ;;  %1090 = vmatpush1.bf16.msra.mxu0 %v1774_v11  ;;  %v1915_v3 = vmul.f32 %v1535_v26, %v593_v0  ;;  %v592_v5 = vld [vmem:[%s2423_s0 + $0x1a0] sm:$0xff]  ;;  %v586_v0 = vld [vmem:[%s2423_s0 + $0x110] sm:$0xff] }
  0x4f   :  { %1131 = vmatpush1.bf16.msra.mxu1 %v1774_v11  ;;  %1092 = vmatprep.subr.bf16.mxu0 %v1091_v28  ;;  %v1931_v9 = vmul.f32 %v1716_v48, %v592_v5  ;;  %v1937_v11 = vmul.f32 %v1535_v26, %v595_v8  ;;  %v2041_v5 = vmul.f32 %v1716_v48, %v600_v1  ;;  %v603_v8 = vld [vmem:[%s2423_s0 + $0x298] sm:$0xff] }
  0x50   :  { %361 = vmatmul.mubr.f32.gmra.mrb[6].mxu1 %v1760_v6  ;;  %1122 = vmatprep.subr.bf16.mxu1 %v1091_v28  ;;  %v583_v6 = vld [vmem:[%s2423_s0 + $0xb8] sm:$0xff]  ;;  %v68_v1 = vmul.f32 %v1654_v19, %v28_v37  ;;  %v32_v37 = vld [vmem:[%s2423_s0 + $0x1b0] sm:$0xff] }
  0x51   :  { %510 = vmatmul.mubr.f32.gmra.mrb[6].mxu0 %v1772_v10  ;;  %366 = vmatprep.mubr.f32.mxu1 %v1786_v16  ;;  %v1957_v21 = vmul.f32 %v1535_v26, %v583_v6  ;;  %v596_v10 = vld [vmem:[%s2423_s0 + $0x200] sm:$0xff]  ;;  %v669_v16 = vld [vmem:[%s2422_s2 + $0x4c8] sm:$0xff]  ;;  %v671_v28 = vld [vmem:[%s2422_s2 + $0x4d8] sm:$0xff]  ;;  %v2064_v6 = vmul.f32 %v1535_v26, %v603_v8 }
  0x52   :  { %515 = vmatprep.mubr.f32.mxu0 %v1789_v17  ;;  %1094 = vmatpush1.bf16.msra.mxu0 %v1809_v29  ;;  %v1983_v32 = vmul.f32 %v1716_v48, %v596_v10  ;;  %v585_v17 = vld [vmem:[%s2423_s0 + $0xe8] sm:$0xff]  ;;  %v1103_v10 = vpack.c.bf16 %v671_v28, %v669_v16  ;;  %v675_v16 = vld [vmem:[%s2422_s2 + $0x4f8] sm:$0xff]  ;;  %v162_v8 = vld [vmem:[%s2423_s0 + $0x190] sm:$0xff] }
  0x53   :  { %1132 = vmatpush1.bf16.msra.mxu1 %v1809_v29  ;;  %1096 = vmatprep.subr.bf16.mxu0 %v1095_v51  ;;  %v1999_v42 = vmul.f32 %v1535_v26, %v585_v17  ;;  %v587_v29 = vld [vmem:[%s2423_s0 + $0x118] sm:$0xff]  ;;  %v670_v17 = vld [vmem:[%s2422_s2 + $0x4d0] sm:$0xff] }
  0x54   :  { %367 = vmatmul.mubr.f32.gmra.mrb[8].mxu1 %v1792_v18  ;;  %1123 = vmatprep.subr.bf16.mxu1 %v1095_v51  ;;  %v2021_v58 = vmul.f32 %v1535_v26, %v587_v29  ;;  %v589_v18 = vld [vmem:[%s2423_s0 + $0x148] sm:$0xff]  ;;  %v2038_v51 = vmul.f32 %v1716_v48, %v586_v0  ;;  %v674_v29 = vld [vmem:[%s2422_s2 + $0x4f0] sm:$0xff]  ;;  %v679_v0 = vld [vmem:[%s2422_s2 + $0x518] sm:$0xff] }
  0x55   :  { %516 = vmatmul.mubr.f32.gmra.mrb[8].mxu0 %v1807_v27  ;;  %372 = vmatprep.mubr.f32.mxu1 %v1821_v33  ;;  %v2044_v7 = vmul.f32 %v1535_v26, %v589_v18  ;;  %v602_v27 = vld [vmem:[%s2423_s0 + $0x290] sm:$0xff]  ;;  %v26_v33 = vld [vmem:[%s2423_s0 + $0x120] sm:$0xff] }
  0x56   :  { %521 = vmatprep.mubr.f32.mxu0 %v1824_v35  ;;  %1098 = vmatpush1.bf16.msra.mxu0 %v1868_v52  ;;  %v2070_v24 = vmul.f32 %v1716_v48, %v602_v27  ;;  %v29_v35 = vld [vmem:[%s2423_s0 + $0x158] sm:$0xff]  ;;  %v668_v26 = vld [vmem:[%s2422_s2 + $0x4c0] sm:$0xff]  ;;  %v198_v48 = vmul.f32 %v1642_v14, %v158_v39  ;;  %v66_v28 = vmul.f32 %v1654_v19, %v26_v33  ;;  %v31_v39 = vld [vmem:[%s2423_s0 + $0x188] sm:$0xff] }
  0x57   :  { %1133 = vmatpush1.bf16.msra.mxu1 %v1868_v52  ;;  %1100 = vmatprep.subr.bf16.mxu0 %v1874_v23  ;;  %v673_v52 = vld [vmem:[%s2422_s2 + $0x4e8] sm:$0xff]  ;;  %v69_v36 = vmul.f32 %v1555_v34, %v29_v35  ;;  %v71_v12 = vmul.f32 %v1555_v34, %v31_v39  ;;  %v30_v27 = vld [vmem:[%s2423_s0 + $0x180] sm:$0xff]  ;;  %v33_v35 = vld [vmem:[%s2423_s0 + $0x1b8] sm:$0xff] }
  0x58   :  { %373 = vmatmul.mubr.f32.gmra.mrb[10].mxu1 %v1839_v40  ;;  %1124 = vmatprep.subr.bf16.mxu1 %v1874_v23  ;;  %v201_v40 = vmul.f32 %v1532_v25, %v161_v13  ;;  %v160_v23 = vld [vmem:[%s2423_s0 + $0x160] sm:$0xff]  ;;  %v165_v33 = vld [vmem:[%s2423_s0 + $0x1c8] sm:$0xff]  ;;  %v1109_v13 = vpack.c.bf16 %v674_v29, %v672_v53  ;;  %v682_v29 = vld [vmem:[%s2422_s2 + $0x530] sm:$0xff] }
  0x59   :  { %522 = vmatmul.mubr.f32.gmra.mrb[10].mxu0 %v1842_v41  ;;  %378 = vmatprep.mubr.f32.mxu1 %v1857_v46  ;;  %v163_v41 = vld [vmem:[%s2423_s0 + $0x198] sm:$0xff]  ;;  %v1105_v46 = vpack.c.bf16 %v670_v17, %v668_v26  ;;  %v200_v56 = vmul.f32 %v1642_v14, %v160_v23  ;;  %v676_v26 = vld [vmem:[%s2422_s2 + $0x500] sm:$0xff]  ;;  %v678_v17 = vld [vmem:[%s2422_s2 + $0x510] sm:$0xff] }
  0x5a   :  { %527 = vmatprep.mubr.f32.mxu0 %v1866_v50  ;;  %1102 = vmatpush1.bf16.msra.mxu0 %v1876_v54  ;;  %v1107_v50 = vpack.c.bf16 %v675_v16, %v673_v52  ;;  %v203_v18 = vmul.f32 %v1532_v25, %v163_v41  ;;  %v681_v52 = vld [vmem:[%s2422_s2 + $0x528] sm:$0xff]  ;;  %v683_v16 = vld [vmem:[%s2422_s2 + $0x538] sm:$0xff]  ;;  %v164_v23 = vld [vmem:[%s2423_s0 + $0x1c0] sm:$0xff] }
  0x5b   :  { %1134 = vmatpush1.bf16.msra.mxu1 %v1876_v54  ;;  %1104 = vmatprep.subr.bf16.mxu0 %v1103_v10  ;;  %v677_v54 = vld [vmem:[%s2422_s2 + $0x508] sm:$0xff]  ;;  %v167_v41 = vld [vmem:[%s2423_s0 + $0x1f8] sm:$0xff]  ;;  %v680_v53 = vld [vmem:[%s2422_s2 + $0x520] sm:$0xff] }
  0x5c   :  { %379 = vmatmul.mubr.f32.gmra.mrb[12].mxu1 %v198_v48  ;;  %1125 = vmatprep.subr.bf16.mxu1 %v1103_v10  ;;  %v1111_v10 = vpack.c.bf16 %v679_v0, %v677_v54  ;;  %v202_v48 = vmul.f32 %v1642_v14, %v162_v8  ;;  %v35_v39 = vld [vmem:[%s2423_s0 + $0x1e8] sm:$0xff]  ;;  %v72_v54 = vmul.f32 %v1654_v19, %v32_v37  ;;  %v34_v8 = vld [vmem:[%s2423_s0 + $0x1e0] sm:$0xff] }
  0x5d   :  { %528 = vmatmul.mubr.f32.gmra.mrb[12].mxu0 %v66_v28  ;;  %384 = vmatprep.mubr.f32.mxu1 %v201_v40  ;;  %v70_v28 = vmul.f32 %v1654_v19, %v30_v27  ;;  %v205_v40 = vmul.f32 %v1532_v25, %v165_v33  ;;  %v207_v0 = vmul.f32 %v1532_v25, %v167_v41  ;;  %v37_v33 = vld [vmem:[%s2423_s0 + $0x218] sm:$0xff] }
  0x5e   :  { %533 = vmatprep.mubr.f32.mxu0 %v69_v36  ;;  %1106 = vmatpush1.bf16.msra.mxu0 %v1105_v46  ;;  %v73_v36 = vmul.f32 %v1555_v34, %v33_v35  ;;  %v1117_v27 = vpack.c.bf16 %v682_v29, %v680_v53  ;;  %v74_v35 = vmul.f32 %v1654_v19, %v34_v8 }
  0x5f   :  { %1135 = vmatpush1.bf16.msra.mxu1 %v1105_v46  ;;  %1108 = vmatprep.subr.bf16.mxu0 %v1107_v50  ;;  %v1113_v46 = vpack.c.bf16 %v678_v17, %v676_v26  ;;  %v168_v26 = vld [vmem:[%s2423_s0 + $0x220] sm:$0xff]  ;;  %v77_v17 = vmul.f32 %v1555_v34, %v37_v33 }
  0x60   :  { %385 = vmatmul.mubr.f32.gmra.mrb[14].mxu1 %v200_v56  ;;  %1126 = vmatprep.subr.bf16.mxu1 %v1107_v50  ;;  %v1115_v50 = vpack.c.bf16 %v683_v16, %v681_v52  ;;  %v204_v56 = vmul.f32 %v1642_v14, %v164_v23  ;;  %v208_v52 = vmul.f32 %v1642_v14, %v168_v26  ;;  %v170_v16 = vld [vmem:[%s2423_s0 + $0x250] sm:$0xff]  ;;  %v172_v23 = vld [vmem:[%s2423_s0 + $0x280] sm:$0xff] }
  0x61   :  { %534 = vmatmul.mubr.f32.gmra.mrb[14].mxu0 %v68_v1  ;;  %390 = vmatprep.mubr.f32.mxu1 %v203_v18  ;;  %v166_v1 = vld [vmem:[%s2423_s0 + $0x1f0] sm:$0xff]  ;;  %v75_v18 = vmul.f32 %v1555_v34, %v35_v39  ;;  %v38_v34 = vld [vmem:[%s2423_s0 + $0x240] sm:$0xff]  ;;  %v212_v37 = vmul.f32 %v1642_v14, %v172_v23 }
  0x62   :  { %539 = vmatprep.mubr.f32.mxu0 %v71_v12  ;;  %1110 = vmatpush1.bf16.msra.mxu0 %v1109_v13  ;;  %v169_v12 = vld [vmem:[%s2423_s0 + $0x228] sm:$0xff] }
  0x63   :  { %1136 = vmatpush1.bf16.msra.mxu1 %v1109_v13  ;;  %1112 = vmatprep.subr.bf16.mxu0 %v1111_v10  ;;  %v206_v13 = vmul.f32 %v1642_v14, %v166_v1 }
  0x64   :  { %391 = vmatmul.mubr.f32.gmra.mrb[16].mxu1 %v202_v48  ;;  %1127 = vmatprep.subr.bf16.mxu1 %v1111_v10  ;;  %v209_v10 = vmul.f32 %v1532_v25, %v169_v12  ;;  %v36_v48 = vld [vmem:[%s2423_s0 + $0x210] sm:$0xff] }
  0x65   :  { %540 = vmatmul.mubr.f32.gmra.mrb[16].mxu0 %v70_v28  ;;  %396 = vmatprep.mubr.f32.mxu1 %v205_v40  ;;  %v76_v25 = vmul.f32 %v1654_v19, %v36_v48  ;;  %v210_v28 = vmul.f32 %v1642_v14, %v170_v16  ;;  %v78_v40 = vmul.f32 %v1654_v19, %v38_v34 }
  0x66   :  { %545 = vmatprep.mubr.f32.mxu0 %v73_v36  ;;  %1114 = vmatpush1.bf16.msra.mxu0 %v1113_v46  ;;  %v40_v36 = vld [vmem:[%s2423_s0 + $0x270] sm:$0xff] }
  0x67   :  { %1137 = vmatpush1.bf16.msra.mxu1 %v1113_v46  ;;  %1116 = vmatprep.subr.bf16.mxu0 %v1115_v50 }
  0x68   :  { %397 = vmatmul.mubr.f32.gmra.mrb[18].mxu1 %v204_v56  ;;  %1128 = vmatprep.subr.bf16.mxu1 %v1115_v50 }
  0x69   :  { %546 = vmatmul.mubr.f32.gmra.mrb[18].mxu0 %v72_v54  ;;  %402 = vmatprep.mubr.f32.mxu1 %v207_v0 }
  0x6a   :  { %551 = vmatprep.mubr.f32.mxu0 %v75_v18  ;;  %1118 = vmatpush1.bf16.msra.mxu0 %v1117_v27 }
  0x6b   :  { %1138 = vmatpush1.bf16.msra.mxu1 %v1117_v27 }
  0x6c   :  { %403 = vmatmul.mubr.f32.gmra.mrb[20].mxu1 %v206_v13 }
  0x6d   :  { %552 = vmatmul.mubr.f32.gmra.mrb[20].mxu0 %v74_v35  ;;  %408 = vmatprep.mubr.f32.mxu1 %v209_v10 }
  0x6e   :  { %557 = vmatprep.mubr.f32.mxu0 %v77_v17 }
  0x70   :  { %409 = vmatmul.mubr.f32.gmra.mrb[22].mxu1 %v208_v52 }
  0x71   :  { %558 = vmatmul.mubr.f32.gmra.mrb[22].mxu0 %v76_v25  ;;  %414 = vmatprep.mubr.f32.mxu1 %v1833_v38  ;;  %v80_v38 = vmul.f32 %v1654_v19, %v40_v36 }
  0x72   :  { %563 = vmatprep.mubr.f32.mxu0 %v1848_v43 }
  0x74   :  { %415 = vmatmul.mubr.f32.gmra.mrb[24].mxu1 %v210_v28 }
  0x75   :  { %564 = vmatmul.mubr.f32.gmra.mrb[24].mxu0 %v78_v40  ;;  %420 = vmatprep.mubr.f32.mxu1 %v1860_v47 }
  0x76   :  { %569 = vmatprep.mubr.f32.mxu0 %v1863_v49 }
  0x78   :  { %421 = vmatmul.mubr.f32.gmra.mrb[26].mxu1 %v212_v37 }
  0x79   :  { %570 = vmatmul.mubr.f32.gmra.mrb[26].mxu0 %v80_v38  ;;  %944 = vmatprep.mubr.msk.f32.mxu1 %vm684_vm0, %v1893_v59 }
  0x7a   :  { %937 = vmatprep.mubr.msk.f32.mxu0 %vm684_vm0, %v1879_v55 }
  0x7c   :  { %834 = vmatmul.mubr.f32.vlgmr.msra.gmra.mrb[28].mxu1 %v1899_v62 }
  0x7d   :  { %792 = vmatmul.mubr.f32.vlgmr.msra.gmra.mrb[0].mxu0 %v1896_v61  ;;  %945 = vmatprep.mubr.msk.f32.mxu1 %vm684_vm0, %v1915_v3 }
  0x7e   :  { %938 = vmatprep.mubr.msk.f32.mxu0 %vm684_vm0, %v1912_v2 }
  0x80   :  { %840 = vmatmul.mubr.f32.gmra.mrb[30].mxu1 %v1931_v9 }
  0x81   :  { %798 = vmatmul.mubr.f32.gmra.mrb[2].mxu0 %v1918_v4  ;;  %946 = vmatprep.mubr.msk.f32.mxu1 %vm684_vm0, %v1937_v11 }
  0x82   :  { %939 = vmatprep.mubr.msk.f32.mxu0 %vm684_vm0, %v1934_v60 }
  0x84   :  { %846 = vmatmul.mubr.f32.gmra.mrb[32].mxu1 %v1954_v20 }
  0x85   :  { %804 = vmatmul.mubr.f32.gmra.mrb[4].mxu0 %v1951_v15  ;;  %947 = vmatprep.mubr.msk.f32.mxu1 %vm684_vm0, %v1977_v30 }
  0x86   :  { %940 = vmatprep.mubr.msk.f32.mxu0 %vm684_vm0, %v1957_v21 }
  0x88   :  { %852 = vmatmul.mubr.f32.gmra.mrb[34].mxu1 %v1983_v32 }
  0x89   :  { %810 = vmatmul.mubr.f32.gmra.mrb[6].mxu0 %v1980_v31  ;;  %948 = vmatprep.mubr.msk.f32.mxu1 %vm684_vm0, %v2002_v44 }
  0x8a   :  { %941 = vmatprep.mubr.msk.f32.mxu0 %vm684_vm0, %v1999_v42 }
  0x8c   :  { %858 = vmatmul.mubr.f32.gmra.mrb[36].mxu1 %v2018_v57 }
  0x8d   :  { %816 = vmatmul.mubr.f32.gmra.mrb[8].mxu0 %v2005_v45  ;;  %949 = vmatprep.mubr.msk.f32.mxu1 %vm684_vm0, %v2024_v63 }
  0x8e   :  { %942 = vmatprep.mubr.msk.f32.mxu0 %vm684_vm0, %v2021_v58 }
  0x90   :  { %864 = vmatmul.mubr.f32.gmra.mrb[38].mxu1 %v2041_v5 }
  0x91   :  { %822 = vmatmul.mubr.f32.gmra.mrb[10].mxu0 %v2038_v51  ;;  %950 = vmatprep.mubr.msk.f32.mxu1 %vm684_vm0, %v2064_v6 }
  0x92   :  { %943 = vmatprep.mubr.msk.f32.mxu0 %vm684_vm0, %v2044_v7 }
  0x94   :  { %870 = vmatmul.mubr.f32.gmra.mrb[40].mxu1 %v2070_v24 }
  0x95   :  { %828 = vmatmul.mubr.f32.gmra.mrb[12].mxu0 %v2067_v22 }
 0x117   :  { %v344_v14 = vpop.f32.mrb[0].mxu1 }
 0x118   :  { %v2264_v19 = vpop.f32.mrb[1].mxu1 }
 0x11b   :  { %v2266_v43 = vpop.f32.mrb[2].mxu1 }
 0x11c   :  { %v2268_v47 = vpop.f32.mrb[3].mxu1 }
 0x11f   :  { %v2270_v49 = vpop.f32.mrb[4].mxu1 }
 0x120   :  { %v2272_v55 = vpop.f32.mrb[5].mxu1 }
 0x123   :  { %v2274_v59 = vpop.f32.mrb[6].mxu1 }
 0x124   :  { %v2276_v61 = vpop.f32.mrb[7].mxu1 }
 0x127   :  { %v2278_v62 = vpop.f32.mrb[8].mxu1 }
 0x128   :  { %v2280_v2 = vpop.f32.mrb[9].mxu1 }
 0x12b   :  { %v2282_v3 = vpop.f32.mrb[10].mxu1 }
 0x12c   :  { %v2284_v4 = vpop.f32.mrb[11].mxu1 }
 0x12f   :  { %v2286_v9 = vpop.f32.mrb[12].mxu1 }
 0x130   :  { %v2288_v60 = vpop.f32.mrb[13].mxu1 }
 0x133   :  { %v386_v11 = vpop.f32.mrb[14].mxu1 }
 0x134   :  { %v535_v15 = vpop.f32.mrb[14].mxu0  ;;  %v388_v20 = vpop.f32.mrb[15].mxu1 }
 0x135   :  { %v536_v21 = vadd.f32 %v535_v15, %v386_v11  ;;  %v537_v30 = vpop.f32.mrb[15].mxu0 }
 0x136   :  { %v538_v31 = vadd.f32 %v537_v30, %v388_v20 }
 0x137   :  { %v392_v32 = vpop.f32.mrb[16].mxu1 }
 0x138   :  { %v541_v42 = vpop.f32.mrb[16].mxu0  ;;  %v394_v44 = vpop.f32.mrb[17].mxu1 }
 0x139   :  { %v542_v45 = vadd.f32 %v541_v42, %v392_v32  ;;  %v543_v57 = vpop.f32.mrb[17].mxu0 }
 0x13a   :  { %v544_v58 = vadd.f32 %v543_v57, %v394_v44 }
 0x13b   :  { %v398_v63 = vpop.f32.mrb[18].mxu1 }
 0x13c   :  { %v547_v51 = vpop.f32.mrb[18].mxu0  ;;  %v400_v5 = vpop.f32.mrb[19].mxu1 }
 0x13d   :  { %v548_v7 = vadd.f32 %v547_v51, %v398_v63  ;;  %v549_v6 = vpop.f32.mrb[19].mxu0 }
 0x13e   :  { %v550_v22 = vadd.f32 %v549_v6, %v400_v5 }
 0x13f   :  { %v404_v24 = vpop.f32.mrb[20].mxu1 }
 0x140   :  { %v553_v41 = vpop.f32.mrb[20].mxu0  ;;  %v406_v46 = vpop.f32.mrb[21].mxu1 }
 0x141   :  { %v554_v39 = vadd.f32 %v553_v41, %v404_v24  ;;  %v555_v50 = vpop.f32.mrb[21].mxu0 }
 0x142   :  { %v2290_v53 = vadd.f32 %v555_v50, %v406_v46 }
 0x143   :  { %v410_v29 = vpop.f32.mrb[22].mxu1 }
 0x144   :  { %v559_v56 = vpop.f32.mrb[22].mxu0  ;;  %v412_v54 = vpop.f32.mrb[23].mxu1 }
 0x145   :  { %v2292_v0 = vadd.f32 %v559_v56, %v410_v29  ;;  %v561_v1 = vpop.f32.mrb[23].mxu0 }
 0x146   :  { %v2294_v18 = vadd.f32 %v561_v1, %v412_v54 }
 0x147   :  { %v416_v8 = vpop.f32.mrb[24].mxu1 }
 0x148   :  { %v565_v12 = vpop.f32.mrb[24].mxu0  ;;  %v418_v27 = vpop.f32.mrb[25].mxu1 }
 0x149   :  { %v2296_v33 = vadd.f32 %v565_v12, %v416_v8  ;;  %v567_v13 = vpop.f32.mrb[25].mxu0 }
 0x14a   :  { %v2298_v35 = vadd.f32 %v567_v13, %v418_v27 }
 0x14b   :  { %v422_v10 = vpop.f32.mrb[26].mxu1 }
 0x14c   :  { %v571_v26 = vpop.f32.mrb[26].mxu0  ;;  %v424_v17 = vpop.f32.mrb[27].mxu1 }
 0x14d   :  { %v2300_v48 = vadd.f32 %v571_v26, %v422_v10  ;;  %v573_v52 = vpop.f32.mrb[27].mxu0 }
 0x14e   :  { %v2302_v25 = vadd.f32 %v573_v52, %v424_v17 }
 0x14f   :  { %v835_v16 = vpop.f32.mrb[28].mxu1 }
 0x150   :  { %v793_v34 = vpop.f32.mrb[0].mxu0  ;;  %v890_v28 = vadd.f32 %v835_v16, %v536_v21  ;;  %v837_v40 = vpop.f32.mrb[29].mxu1 }
 0x151   :  { %v1139_v23 = vadd.f32 %v793_v34, %v344_v14  ;;  %v795_v36 = vpop.f32.mrb[1].mxu0  ;;  %v891_v37 = vadd.f32 %v837_v40, %v538_v31 }
 0x152   :  { %919 = vst [vmem:[%s2425_s3 + $0x70] sm:$0xff] %v890_v28  ;;  %v1140_v38 = vadd.f32 %v795_v36, %v2264_v19 }
 0x153   :  { %904 = vst [vmem:[%s2425_s3] sm:$0xff] %v1139_v23  ;;  %920 = vst.msk [vmem:[%s2425_s3 + $0x78] sm:$0xff] %vm905_vm1, %v891_v37  ;;  %v841_v11 = vpop.f32.mrb[30].mxu1 }
 0x154   :  { %906 = vst.msk [vmem:[%s2425_s3 + $0x8] sm:$0xff] %vm905_vm1, %v1140_v38  ;;  %v799_v14 = vpop.f32.mrb[2].mxu0  ;;  %v892_v15 = vadd.f32 %v841_v11, %v542_v45  ;;  %v843_v20 = vpop.f32.mrb[31].mxu1 }
 0x155   :  { %v1141_v19 = vadd.f32 %v799_v14, %v2266_v43  ;;  %v801_v21 = vpop.f32.mrb[3].mxu0  ;;  %v893_v30 = vadd.f32 %v843_v20, %v544_v58 }
 0x156   :  { %921 = vst [vmem:[%s2425_s3 + $0x80] sm:$0xff] %v892_v15  ;;  %v1142_v31 = vadd.f32 %v801_v21, %v2268_v47 }
 0x157   :  { %907 = vst [vmem:[%s2425_s3 + $0x10] sm:$0xff] %v1141_v19  ;;  %922 = vst.msk [vmem:[%s2425_s3 + $0x88] sm:$0xff] %vm905_vm1, %v893_v30  ;;  %v847_v32 = vpop.f32.mrb[32].mxu1 }
 0x158   :  { %908 = vst.msk [vmem:[%s2425_s3 + $0x18] sm:$0xff] %vm905_vm1, %v1142_v31  ;;  %v805_v43 = vpop.f32.mrb[4].mxu0  ;;  %v894_v42 = vadd.f32 %v847_v32, %v548_v7  ;;  %v849_v44 = vpop.f32.mrb[33].mxu1 }
 0x159   :  { %v1143_v47 = vadd.f32 %v805_v43, %v2270_v49  ;;  %v807_v45 = vpop.f32.mrb[5].mxu0  ;;  %v895_v57 = vadd.f32 %v849_v44, %v550_v22 }
 0x15a   :  { %923 = vst [vmem:[%s2425_s3 + $0x90] sm:$0xff] %v894_v42  ;;  %v1144_v58 = vadd.f32 %v807_v45, %v2272_v55 }
 0x15b   :  { %909 = vst [vmem:[%s2425_s3 + $0x20] sm:$0xff] %v1143_v47  ;;  %924 = vst.msk [vmem:[%s2425_s3 + $0x98] sm:$0xff] %vm905_vm1, %v895_v57  ;;  %v853_v63 = vpop.f32.mrb[34].mxu1 }
 0x15c   :  { %910 = vst.msk [vmem:[%s2425_s3 + $0x28] sm:$0xff] %vm905_vm1, %v1144_v58  ;;  %v811_v49 = vpop.f32.mrb[6].mxu0  ;;  %v896_v51 = vadd.f32 %v853_v63, %v554_v39  ;;  %v855_v5 = vpop.f32.mrb[35].mxu1 }
 0x15d   :  { %v1145_v55 = vadd.f32 %v811_v49, %v2274_v59  ;;  %v813_v7 = vpop.f32.mrb[7].mxu0  ;;  %v897_v6 = vadd.f32 %v855_v5, %v2290_v53 }
 0x15e   :  { %925 = vst [vmem:[%s2425_s3 + $0xa0] sm:$0xff] %v896_v51  ;;  %v1146_v22 = vadd.f32 %v813_v7, %v2276_v61 }
 0x15f   :  { %911 = vst [vmem:[%s2425_s3 + $0x30] sm:$0xff] %v1145_v55  ;;  %926 = vst.msk [vmem:[%s2425_s3 + $0xa8] sm:$0xff] %vm905_vm1, %v897_v6  ;;  %v859_v24 = vpop.f32.mrb[36].mxu1 }
 0x160   :  { %912 = vst.msk [vmem:[%s2425_s3 + $0x38] sm:$0xff] %vm905_vm1, %v1146_v22  ;;  %v817_v59 = vpop.f32.mrb[8].mxu0  ;;  %v898_v41 = vadd.f32 %v859_v24, %v2292_v0  ;;  %v861_v46 = vpop.f32.mrb[37].mxu1 }
 0x161   :  { %v1147_v61 = vadd.f32 %v817_v59, %v2278_v62  ;;  %v819_v39 = vpop.f32.mrb[9].mxu0  ;;  %v899_v50 = vadd.f32 %v861_v46, %v2294_v18 }
 0x162   :  { %927 = vst [vmem:[%s2425_s3 + $0xb0] sm:$0xff] %v898_v41  ;;  %v1148_v53 = vadd.f32 %v819_v39, %v2280_v2 }
 0x163   :  { %913 = vst [vmem:[%s2425_s3 + $0x40] sm:$0xff] %v1147_v61  ;;  %928 = vst.msk [vmem:[%s2425_s3 + $0xb8] sm:$0xff] %vm905_vm1, %v899_v50  ;;  %v865_v29 = vpop.f32.mrb[38].mxu1 }
 0x164   :  { %914 = vst.msk [vmem:[%s2425_s3 + $0x48] sm:$0xff] %vm905_vm1, %v1148_v53  ;;  %v823_v62 = vpop.f32.mrb[10].mxu0  ;;  %v900_v56 = vadd.f32 %v865_v29, %v2296_v33  ;;  %v867_v54 = vpop.f32.mrb[39].mxu1 }
 0x165   :  { %v1149_v2 = vadd.f32 %v823_v62, %v2282_v3  ;;  %v825_v0 = vpop.f32.mrb[11].mxu0  ;;  %v901_v1 = vadd.f32 %v867_v54, %v2298_v35 }
 0x166   :  { %929 = vst [vmem:[%s2425_s3 + $0xc0] sm:$0xff] %v900_v56  ;;  %v1150_v18 = vadd.f32 %v825_v0, %v2284_v4 }
 0x167   :  { %915 = vst [vmem:[%s2425_s3 + $0x50] sm:$0xff] %v1149_v2  ;;  %930 = vst.msk [vmem:[%s2425_s3 + $0xc8] sm:$0xff] %vm905_vm1, %v901_v1  ;;  %v871_v8 = vpop.f32.mrb[40].mxu1 }
 0x168   :  { %916 = vst.msk [vmem:[%s2425_s3 + $0x58] sm:$0xff] %vm905_vm1, %v1150_v18  ;;  %v829_v3 = vpop.f32.mrb[12].mxu0  ;;  %v902_v12 = vadd.f32 %v871_v8, %v2300_v48  ;;  %v873_v27 = vpop.f32.mrb[41].mxu1 }
 0x169   :  { %v1151_v4 = vadd.f32 %v829_v3, %v2286_v9  ;;  %v831_v33 = vpop.f32.mrb[13].mxu0  ;;  %v903_v13 = vadd.f32 %v873_v27, %v2302_v25 }
 0x16a   :  { %931 = vst [vmem:[%s2425_s3 + $0xd0] sm:$0xff] %v902_v12  ;;  %v1152_v35 = vadd.f32 %v831_v33, %v2288_v60 }
 0x16b   :  { %917 = vst [vmem:[%s2425_s3 + $0x60] sm:$0xff] %v1151_v4  ;;  %932 = vst.msk [vmem:[%s2425_s3 + $0xd8] sm:$0xff] %vm905_vm1, %v903_v13 }
 0x16c   :  { %918 = vst.msk [vmem:[%s2425_s3 + $0x68] sm:$0xff] %vm905_vm1, %v1152_v35 }

</bundles_post_ra>
